<compile_context>
chip_gen: v7x
topology: tpu7x:2x2x1
jax: 0.10.0
libtpu: 0.0.40
codegen_flags: <defaults>
</compile_context>

<pallas_src>
import math
from functools import partial

import jax
import jax.numpy as jnp
from jax.experimental import pallas as pl
from jax.experimental.pallas import tpu as pltpu


def _stconv_kernel(x_ref, w_ref, o_ref, *, TB, kT, Kp, HW):
    # x_ref : [1, (TB + kT - 1) * Kp, HW]   spatially-im2col'd sliding time window
    # w_ref : [F, kT * Kp]                  lag+tap flattened weights (constant block)
    # o_ref : [TB, F, HW]                   lane-dense output block (HW last)
    w = w_ref[...]
    for t in range(TB):                                    # static unroll over timesteps
        # rows [t*Kp, (t+kT)*Kp) == the kT lag frames for output timestep t,
        # already laid out as a dense [K, HW] matmul operand (Kp % 8 == 0, so
        # this is a tile-aligned slice, no sublane shifting).
        p = x_ref[0, t * Kp:(t + kT) * Kp, :]              # [kT*Kp, HW]
        o_ref[t] = jnp.dot(w, p,
                           preferred_element_type=jnp.float32).astype(o_ref.dtype)


def stconv_forward(x_flat, weight, input_dims, *, positive_constraint=False,
                   time_block=8):
    """Pallas implementation of STconv.forward (tent_spacing=None, bias=None,
    stride=1, dilation=1).

    x_flat : [N, C*H*W]   (time is the batch dimension, as in the reference)
    weight : [F, C, kT, kH, kW]
    returns: [N, F, Hout, Wout]
    """
    C, H, W = input_dims
    F_out, Cw, kT, kH, kW = weight.shape
    assert Cw == C
    N = x_flat.shape[0]

    # ---- padding: replicates the reference's pad tuple exactly, including that
    # W is padded from kH and H from kW (only distinguishable for kH != kW). ----
    pw = (kH // 2, (kH - 1 + kH % 2) // 2)                     # pad on W
    ph = (kW // 2, (kW - 1 + kW % 2) // 2)                     # pad on H
    # TODO(synk): reference computes num_lags-1-(1-tent_spacing%2), which raises
    # for tent_spacing=None; we use the causal pad num_lags-1 for that path.
    pt = (kT - 1, 0)

    x = x_flat.reshape(N, C, H, W).transpose(0, 2, 3, 1)       # [N, H, W, C]
    xp = jnp.pad(x, (pt, ph, pw, (0, 0)))                      # [Tp, Hp, Wp, C]
    Tp, Hp, Wp, _ = xp.shape
    Hout = Hp - kH + 1
    Wout = Wp - kW + 1
    HW = Hout * Wout

    # ---- spatial im2col (done once, in XLA): xs[t, (ih,iw,c), (h,w)] ----
    slabs = []
    for ih in range(kH):
        for iw in range(kW):
            s = xp[:, ih:ih + Hout, iw:iw + Wout, :]           # [Tp, Hout, Wout, C]
            slabs.append(jnp.transpose(s, (0, 3, 1, 2)).reshape(Tp, C, HW))
    Ksp = kH * kW * C
    Kp = ((Ksp + 7) // 8) * 8                                  # sublane-align
    xs = jnp.stack(slabs, axis=1).reshape(Tp, Ksp, HW)         # [Tp, Ksp, HW]
    xs = jnp.pad(xs, ((0, 0), (0, Kp - Ksp), (0, 0)))          # [Tp, Kp, HW]

    # ---- weights: hoist positive constraint + flatten to [F, kT*Kp] once ----
    w = weight
    if positive_constraint:
        w = jnp.maximum(w, 0.0)
    wf = jnp.transpose(w, (0, 2, 3, 4, 1))                     # [F, kT, kH, kW, C]
    wf = wf.reshape(F_out, kT, Ksp)
    wf = jnp.pad(wf, ((0, 0), (0, 0), (0, Kp - Ksp)))
    wf = wf.reshape(F_out, kT * Kp)                            # [F, kT*Kp]

    # ---- time blocking: TB output steps per grid step, sliding window inputs ----
    TB = max(1, min(time_block, N))
    num_tb = (N + TB - 1) // TB
    N_pad = num_tb * TB
    TW = TB + kT - 1
    xs = jnp.pad(xs, ((0, N_pad - N), (0, 0), (0, 0)))         # [N_pad+kT-1, Kp, HW]
    starts = jnp.arange(num_tb) * TB
    idx = starts[:, None] + jnp.arange(TW)[None, :]            # [num_tb, TW]
    xsb = xs[idx].reshape(num_tb, TW * Kp, HW)                 # [num_tb, TW*Kp, HW]

    kern = partial(_stconv_kernel, TB=TB, kT=kT, Kp=Kp, HW=HW)

    y = pl.pallas_call(
        kern,
        out_shape=jax.ShapeDtypeStruct((N_pad, F_out, HW), x_flat.dtype),
        grid_spec=pltpu.PrefetchScalarGridSpec(
            num_scalar_prefetch=0,
            grid=(num_tb,),
            in_specs=[
                # windowed input: O(TB+kT) VMEM per step, pipelined across blocks
                pl.BlockSpec((1, TW * Kp, HW), lambda i: (i, 0, 0)),
                # weights: tiny, constant index map -> fetched once, never re-DMA'd
                pl.BlockSpec((F_out, kT * Kp), lambda i: (0, 0)),
            ],
            out_specs=pl.BlockSpec((TB, F_out, HW), lambda i: (i, 0, 0)),
        ),
        compiler_params=pltpu.CompilerParams(
            dimension_semantics=("parallel",)),
    )(xsb, wf)

    # [N_pad, F, HW] -> [N, F, Hout, Wout] (pure reshape, no transpose needed)
    return y[:N].reshape(N, F_out, Hout, Wout)


def stconv_reference(x_flat, weight, input_dims):
    """Pure-JAX reference, mirroring the PyTorch forward (conv3d path)."""
    C, H, W = input_dims
    N = x_flat.shape[0]
    _, _, kT, kH, kW = weight.shape
    s = x_flat.reshape(N, C, H, W, 1).transpose(4, 1, 0, 2, 3)     # [1, C, N, H, W]
    pw = (kH // 2, (kH - 1 + kH % 2) // 2)
    ph = (kW // 2, (kW - 1 + kW % 2) // 2)
    pt = (kT - 1, 0)
    sp = jnp.pad(s, ((0, 0), (0, 0), pt, ph, pw))
    y = jax.lax.conv_general_dilated(
        sp, weight, window_strides=(1, 1, 1), padding='VALID',
        dimension_numbers=('NCDHW', 'OIDHW', 'NCDHW'))
    return jnp.transpose(y[0], (1, 0, 2, 3))                       # [N, F, Hout, Wout]


if __name__ == "__main__":
    # Small shapes: C=4, H=W=16 spatial, N=8 time samples, F=8, kT=6 lags, 3x3 spatial taps.
    C, H, W = 4, 16, 16
    N = 8
    F_out, kT, kH, kW = 8, 6, 3, 3

    key = jax.random.PRNGKey(0)
    kx, kw = jax.random.split(key)

    x = jax.random.normal(kx, (N, C * H * W), dtype=jnp.float32)

    # kaiming_uniform_(a=sqrt(5)) -> uniform in [-b, b], b = 1/sqrt(fan_in)
    fan_in = C * kT * kH * kW
    bound = 1.0 / math.sqrt(fan_in)
    weight = jax.random.uniform(kw, (F_out, C, kT, kH, kW),
                                minval=-bound, maxval=bound, dtype=jnp.float32)

    y = stconv_forward(x, weight, (C, H, W))
    y = jax.block_until_ready(y)

    y_ref = stconv_reference(x, weight, (C, H, W))
    assert y.shape == (N, F_out, H, W), y.shape
    assert jnp.allclose(y, y_ref, atol=1e-4, rtol=1e-4), "mismatch vs reference"

    print("KERNEL_OK")
</pallas_src>

<mosaic_0001>
module attributes {stable_mosaic.version = 11 : i64} {
  func.func @_stconv_kernel(%arg0: i32, %arg1: memref<1x520x256xf32, #tpu.memory_space<vmem>>, %arg2: memref<8x240xf32, #tpu.memory_space<vmem>>, %arg3: memref<8x8x256xf32, #tpu.memory_space<vmem>>) attributes {dimension_semantics = [#tpu.dimension_semantics<parallel>], iteration_bounds = array<i64: 1>, scalar_prefetch = 0 : i64, scratch_operands = 0 : i64, tpu.core_type = #tpu.core_type<tc>, window_params = [{transform_indices = @transform_0, window_bounds = array<i64: 1, 520, 256>}, {pipeline_mode = #tpu.pipeline_mode<synchronous>, transform_indices = @transform_1, window_bounds = array<i64: 8, 240>}, {transform_indices = @transform_2, window_bounds = array<i64: 8, 8, 256>}]} {
    %c0 = arith.constant 0 : index
    %c0_0 = arith.constant 0 : index
    %0 = vector.load %arg2[%c0, %c0_0] : memref<8x240xf32, #tpu.memory_space<vmem>>, vector<8x240xf32>
    %c0_1 = arith.constant 0 : index
    %c0_2 = arith.constant 0 : index
    %c0_3 = arith.constant 0 : index
    %1 = vector.load %arg1[%c0_1, %c0_2, %c0_3] : memref<1x520x256xf32, #tpu.memory_space<vmem>>, vector<1x240x256xf32>
    %2 = vector.shape_cast %1 : vector<1x240x256xf32> to vector<240x256xf32>
    %cst = arith.constant dense<0.000000e+00> : vector<8x256xf32>
    %3 = tpu.matmul %0, %2, %cst {dimension_numbers = #tpu.dot_dimension_numbers<[1], [0], [0], [1], [0, 0, 1, 1], [], []>} : vector<8x240xf32>, vector<240x256xf32>, vector<8x256xf32> -> vector<8x256xf32>
    %c0_4 = arith.constant 0 : index
    %c0_5 = arith.constant 0 : index
    %c0_6 = arith.constant 0 : index
    %4 = vector.load %arg3[%c0_4, %c0_5, %c0_6] : memref<8x8x256xf32, #tpu.memory_space<vmem>>, vector<1x8x256xf32>
    %5 = vector.shape_cast %4 : vector<1x8x256xf32> to vector<8x256xf32>
    %6 = vector.shape_cast %3 : vector<8x256xf32> to vector<1x8x256xf32>
    tpu.vector_store %arg3[%c0_4, %c0_5, %c0_6], %6 {strides = array<i32>} : memref<8x8x256xf32, #tpu.memory_space<vmem>>, vector<1x8x256xf32>,
    %c0_7 = arith.constant 0 : index
    %c40 = arith.constant 40 : index
    %c0_8 = arith.constant 0 : index
    %7 = vector.load %arg1[%c0_7, %c40, %c0_8] : memref<1x520x256xf32, #tpu.memory_space<vmem>>, vector<1x240x256xf32>
    %8 = vector.shape_cast %7 : vector<1x240x256xf32> to vector<240x256xf32>
    %cst_9 = arith.constant dense<0.000000e+00> : vector<8x256xf32>
    %9 = tpu.matmul %0, %8, %cst_9 {dimension_numbers = #tpu.dot_dimension_numbers<[1], [0], [0], [1], [0, 0, 1, 1], [], []>} : vector<8x240xf32>, vector<240x256xf32>, vector<8x256xf32> -> vector<8x256xf32>
    %c1 = arith.constant 1 : index
    %c0_10 = arith.constant 0 : index
    %c0_11 = arith.constant 0 : index
    %10 = vector.load %arg3[%c1, %c0_10, %c0_11] : memref<8x8x256xf32, #tpu.memory_space<vmem>>, vector<1x8x256xf32>
    %11 = vector.shape_cast %10 : vector<1x8x256xf32> to vector<8x256xf32>
    %12 = vector.shape_cast %9 : vector<8x256xf32> to vector<1x8x256xf32>
    tpu.vector_store %arg3[%c1, %c0_10, %c0_11], %12 {strides = array<i32>} : memref<8x8x256xf32, #tpu.memory_space<vmem>>, vector<1x8x256xf32>,
    %c0_12 = arith.constant 0 : index
    %c80 = arith.constant 80 : index
    %c0_13 = arith.constant 0 : index
    %13 = vector.load %arg1[%c0_12, %c80, %c0_13] : memref<1x520x256xf32, #tpu.memory_space<vmem>>, vector<1x240x256xf32>
    %14 = vector.shape_cast %13 : vector<1x240x256xf32> to vector<240x256xf32>
    %cst_14 = arith.constant dense<0.000000e+00> : vector<8x256xf32>
    %15 = tpu.matmul %0, %14, %cst_14 {dimension_numbers = #tpu.dot_dimension_numbers<[1], [0], [0], [1], [0, 0, 1, 1], [], []>} : vector<8x240xf32>, vector<240x256xf32>, vector<8x256xf32> -> vector<8x256xf32>
    %c2 = arith.constant 2 : index
    %c0_15 = arith.constant 0 : index
    %c0_16 = arith.constant 0 : index
    %16 = vector.load %arg3[%c2, %c0_15, %c0_16] : memref<8x8x256xf32, #tpu.memory_space<vmem>>, vector<1x8x256xf32>
    %17 = vector.shape_cast %16 : vector<1x8x256xf32> to vector<8x256xf32>
    %18 = vector.shape_cast %15 : vector<8x256xf32> to vector<1x8x256xf32>
    tpu.vector_store %arg3[%c2, %c0_15, %c0_16], %18 {strides = array<i32>} : memref<8x8x256xf32, #tpu.memory_space<vmem>>, vector<1x8x256xf32>,
    %c0_17 = arith.constant 0 : index
    %c120 = arith.constant 120 : index
    %c0_18 = arith.constant 0 : index
    %19 = vector.load %arg1[%c0_17, %c120, %c0_18] : memref<1x520x256xf32, #tpu.memory_space<vmem>>, vector<1x240x256xf32>
    %20 = vector.shape_cast %19 : vector<1x240x256xf32> to vector<240x256xf32>
    %cst_19 = arith.constant dense<0.000000e+00> : vector<8x256xf32>
    %21 = tpu.matmul %0, %20, %cst_19 {dimension_numbers = #tpu.dot_dimension_numbers<[1], [0], [0], [1], [0, 0, 1, 1], [], []>} : vector<8x240xf32>, vector<240x256xf32>, vector<8x256xf32> -> vector<8x256xf32>
    %c3 = arith.constant 3 : index
    %c0_20 = arith.constant 0 : index
    %c0_21 = arith.constant 0 : index
    %22 = vector.load %arg3[%c3, %c0_20, %c0_21] : memref<8x8x256xf32, #tpu.memory_space<vmem>>, vector<1x8x256xf32>
    %23 = vector.shape_cast %22 : vector<1x8x256xf32> to vector<8x256xf32>
    %24 = vector.shape_cast %21 : vector<8x256xf32> to vector<1x8x256xf32>
    tpu.vector_store %arg3[%c3, %c0_20, %c0_21], %24 {strides = array<i32>} : memref<8x8x256xf32, #tpu.memory_space<vmem>>, vector<1x8x256xf32>,
    %c0_22 = arith.constant 0 : index
    %c160 = arith.constant 160 : index
    %c0_23 = arith.constant 0 : index
    %25 = vector.load %arg1[%c0_22, %c160, %c0_23] : memref<1x520x256xf32, #tpu.memory_space<vmem>>, vector<1x240x256xf32>
    %26 = vector.shape_cast %25 : vector<1x240x256xf32> to vector<240x256xf32>
    %cst_24 = arith.constant dense<0.000000e+00> : vector<8x256xf32>
    %27 = tpu.matmul %0, %26, %cst_24 {dimension_numbers = #tpu.dot_dimension_numbers<[1], [0], [0], [1], [0, 0, 1, 1], [], []>} : vector<8x240xf32>, vector<240x256xf32>, vector<8x256xf32> -> vector<8x256xf32>
    %c4 = arith.constant 4 : index
    %c0_25 = arith.constant 0 : index
    %c0_26 = arith.constant 0 : index
    %28 = vector.load %arg3[%c4, %c0_25, %c0_26] : memref<8x8x256xf32, #tpu.memory_space<vmem>>, vector<1x8x256xf32>
    %29 = vector.shape_cast %28 : vector<1x8x256xf32> to vector<8x256xf32>
    %30 = vector.shape_cast %27 : vector<8x256xf32> to vector<1x8x256xf32>
    tpu.vector_store %arg3[%c4, %c0_25, %c0_26], %30 {strides = array<i32>} : memref<8x8x256xf32, #tpu.memory_space<vmem>>, vector<1x8x256xf32>,
    %c0_27 = arith.constant 0 : index
    %c200 = arith.constant 200 : index
    %c0_28 = arith.constant 0 : index
    %31 = vector.load %arg1[%c0_27, %c200, %c0_28] : memref<1x520x256xf32, #tpu.memory_space<vmem>>, vector<1x240x256xf32>
    %32 = vector.shape_cast %31 : vector<1x240x256xf32> to vector<240x256xf32>
    %cst_29 = arith.constant dense<0.000000e+00> : vector<8x256xf32>
    %33 = tpu.matmul %0, %32, %cst_29 {dimension_numbers = #tpu.dot_dimension_numbers<[1], [0], [0], [1], [0, 0, 1, 1], [], []>} : vector<8x240xf32>, vector<240x256xf32>, vector<8x256xf32> -> vector<8x256xf32>
    %c5 = arith.constant 5 : index
    %c0_30 = arith.constant 0 : index
    %c0_31 = arith.constant 0 : index
    %34 = vector.load %arg3[%c5, %c0_30, %c0_31] : memref<8x8x256xf32, #tpu.memory_space<vmem>>, vector<1x8x256xf32>
    %35 = vector.shape_cast %34 : vector<1x8x256xf32> to vector<8x256xf32>
    %36 = vector.shape_cast %33 : vector<8x256xf32> to vector<1x8x256xf32>
    tpu.vector_store %arg3[%c5, %c0_30, %c0_31], %36 {strides = array<i32>} : memref<8x8x256xf32, #tpu.memory_space<vmem>>, vector<1x8x256xf32>,
    %c0_32 = arith.constant 0 : index
    %c240 = arith.constant 240 : index
    %c0_33 = arith.constant 0 : index
    %37 = vector.load %arg1[%c0_32, %c240, %c0_33] : memref<1x520x256xf32, #tpu.memory_space<vmem>>, vector<1x240x256xf32>
    %38 = vector.shape_cast %37 : vector<1x240x256xf32> to vector<240x256xf32>
    %cst_34 = arith.constant dense<0.000000e+00> : vector<8x256xf32>
    %39 = tpu.matmul %0, %38, %cst_34 {dimension_numbers = #tpu.dot_dimension_numbers<[1], [0], [0], [1], [0, 0, 1, 1], [], []>} : vector<8x240xf32>, vector<240x256xf32>, vector<8x256xf32> -> vector<8x256xf32>
    %c6 = arith.constant 6 : index
    %c0_35 = arith.constant 0 : index
    %c0_36 = arith.constant 0 : index
    %40 = vector.load %arg3[%c6, %c0_35, %c0_36] : memref<8x8x256xf32, #tpu.memory_space<vmem>>, vector<1x8x256xf32>
    %41 = vector.shape_cast %40 : vector<1x8x256xf32> to vector<8x256xf32>
    %42 = vector.shape_cast %39 : vector<8x256xf32> to vector<1x8x256xf32>
    tpu.vector_store %arg3[%c6, %c0_35, %c0_36], %42 {strides = array<i32>} : memref<8x8x256xf32, #tpu.memory_space<vmem>>, vector<1x8x256xf32>,
    %c0_37 = arith.constant 0 : index
    %c280 = arith.constant 280 : index
    %c0_38 = arith.constant 0 : index
    %43 = vector.load %arg1[%c0_37, %c280, %c0_38] : memref<1x520x256xf32, #tpu.memory_space<vmem>>, vector<1x240x256xf32>
    %44 = vector.shape_cast %43 : vector<1x240x256xf32> to vector<240x256xf32>
    %cst_39 = arith.constant dense<0.000000e+00> : vector<8x256xf32>
    %45 = tpu.matmul %0, %44, %cst_39 {dimension_numbers = #tpu.dot_dimension_numbers<[1], [0], [0], [1], [0, 0, 1, 1], [], []>} : vector<8x240xf32>, vector<240x256xf32>, vector<8x256xf32> -> vector<8x256xf32>
    %c7 = arith.constant 7 : index
    %c0_40 = arith.constant 0 : index
    %c0_41 = arith.constant 0 : index
    %46 = vector.load %arg3[%c7, %c0_40, %c0_41] : memref<8x8x256xf32, #tpu.memory_space<vmem>>, vector<1x8x256xf32>
    %47 = vector.shape_cast %46 : vector<1x8x256xf32> to vector<8x256xf32>
    %48 = vector.shape_cast %45 : vector<8x256xf32> to vector<1x8x256xf32>
    tpu.vector_store %arg3[%c7, %c0_40, %c0_41], %48 {strides = array<i32>} : memref<8x8x256xf32, #tpu.memory_space<vmem>>, vector<1x8x256xf32>,
    return
  }
  func.func @transform_0(%arg0: i32) -> (i32, i32, i32) {
    %c0_i32 = arith.constant 0 : i32
    %c0_i32_0 = arith.constant 0 : i32
    %c0_i32_1 = arith.constant 0 : i32
    return %arg0, %c0_i32, %c0_i32_0 : i32, i32, i32
  }
  func.func @transform_1(%arg0: i32) -> (i32, i32) {
    %c0_i32 = arith.constant 0 : i32
    %c0_i32_0 = arith.constant 0 : i32
    %c0_i32_1 = arith.constant 0 : i32
    return %c0_i32, %c0_i32_0 : i32, i32
  }
  func.func @transform_2(%arg0: i32) -> (i32, i32, i32) {
    %c0_i32 = arith.constant 0 : i32
    %c0_i32_0 = arith.constant 0 : i32
    %c0_i32_1 = arith.constant 0 : i32
    return %arg0, %c0_i32, %c0_i32_0 : i32, i32, i32
  }
}

</mosaic_0001>

<bundles_post_ra>
// kernel: tpu_custom_call.1
= control target key start
LH: loop header
LB: loop body
LE: loop exit
PB: predicated region body
PF: predicated region fallthrough
CT: control target
= control target key end

     0   :  { %7 = vsyncpa [#allocation3], 0  ;;  %s2268_s0 = inlined_call_operand.hbm [shape: f32[1,520,256], index: 0, kind: input, shape index: {}]   ;;  %s2269_s1 = inlined_call_operand.hbm [shape: f32[8,240], index: 1, kind: input, shape index: {}]   ;;  %s2270_s2 = inlined_call_operand.hbm [shape: f32[8,8,256], index: 2, kind: output, shape index: {}]  }
   0x1   :  { %8 = vsyncpa [#allocation6], 0 }
   0x2   :  { %9 = vsyncpa [#allocation4], 0  ;;  %s1698_s9 = smov [#allocation2]   ;;  %s1626_s13 = scalar_lea.hbm %s2268_s0, 16640 }
   0x3   :  { %s15_s10 = sshll.u32 %s1698_s9, 4  ;;  %p1627_p0 = scmp.ne.s32.totalorder %s2268_s0, %s1626_s13  ;;  %s16_s10 = int_to_ptr.vmem [resolvable:$true] %s15_s10 }
   0x4   :  { %p1630_p1 = scmp.lt.u32.totalorder %s1626_s13, %s2268_s0 }
   0x6   :  { %p1632_p2 = pnand %p1630_p1, %p1627_p0 }
   0x8   :  { %1635 = shalt.err (!%p1632_p2)
}
   0x9   :  { %s1636_s18 = scalar_lea.vmem %s16_s10, 16640  ;;  %p1641_p4 = scmp.lt.s32.totalorder %s16_s10, %s16_s10 }
   0xa   :  { %p1637_p3 = scmp.ne.s32.totalorder %s16_s10, %s1636_s18  ;;  %p1642_p5 = scmp.lt.s32.totalorder %s1636_s18, %s1636_s18 }
   0xc   :  { %p1643_p6 = por %p1642_p5, %p1641_p4 }
   0xe   :  { %p1644_p7 = pnand %p1643_p6, %p1637_p3 }
  0x10   :  { %1647 = shalt.err (!%p1644_p7)
}
  0x11   :  { %s1699_s19 = smov 256   ;;  %s1700_s20 = smov 16  }
  0x12   :  { %21 = dma.hbm_to_vmem [thread:$0]  %s2268_s0, 16640, %s16_s10, [#allocation3], %s1699_s19, %s1699_s19, %s1700_s20  }
  0x13   :  { %s1701_s23 = smov [#allocation5]   ;;  %s1648_s27 = scalar_lea.hbm %s2269_s1, 256 }
  0x14   :  { %s28_s24 = sshll.u32 %s1701_s23, 4  ;;  %p1649_p8 = scmp.ne.s32.totalorder %s2269_s1, %s1648_s27  ;;  %s29_s24 = int_to_ptr.vmem [resolvable:$true] %s28_s24 }
  0x15   :  { %p1652_p9 = scmp.lt.u32.totalorder %s1648_s27, %s2269_s1 }
  0x17   :  { %p1654_p10 = pnand %p1652_p9, %p1649_p8 }
  0x19   :  { %1657 = shalt.err (!%p1654_p10)
}
  0x1a   :  { %s1658_s4 = scalar_lea.vmem %s29_s24, 256  ;;  %p1663_p12 = scmp.lt.s32.totalorder %s29_s24, %s29_s24 }
  0x1b   :  { %p1659_p11 = scmp.ne.s32.totalorder %s29_s24, %s1658_s4  ;;  %p1664_p13 = scmp.lt.s32.totalorder %s1658_s4, %s1658_s4 }
  0x1d   :  { %p1665_p0 = por %p1664_p13, %p1663_p12 }
  0x1f   :  { %p1666_p1 = pnand %p1665_p0, %p1659_p11 }
  0x21   :  { %1669 = shalt.err (!%p1666_p1)
}
  0x22   :  { %31 = dma.hbm_to_vmem [thread:$0]  %s2269_s1, 256, %s29_s24, [#allocation6]  }
  0x23   :  { %1692 = dma.done.wait [#allocation3], 16640  }
  0x24   :  { %1693 = vsyncadd [#allocation3], 4294950656 }
  0x25   :  { %1694 = dma.done.wait [#allocation6], 256  }
  0x26   :  { %1695 = vsyncadd [#allocation6], 4294967040  ;;  %v41_v0 = vld [vmem:[#allocation2 + $0x8] sm:$0xff]  ;;  %v43_v1 = vld [vmem:[#allocation2 + $0x18] sm:$0xff]  ;;  %vm100_vm0 = vcmask 916480   ;;  %s1702_s1 = smov [#allocation7]  }
  0x27   :  { %v178_v2 = vld [vmem:[#allocation2 + $0x58] sm:$0xff]  ;;  %v1141_v3 = vpack.c.bf16 %v43_v1, %v41_v0  ;;  %v180_v4 = vld [vmem:[#allocation2 + $0x68] sm:$0xff]  ;;  %v40_v5 = vld [vmem:[#allocation2] sm:$0xff]  ;;  %s1120_s6 = sshll.u32 %s1702_s1, 4  ;;  %s1121_s6 = int_to_ptr.vmem [resolvable:$true] %s1120_s6 }
  0x28   :  { %v42_v6 = vld [vmem:[#allocation2 + $0x10] sm:$0xff]  ;;  %v1201_v7 = vpack.c.bf16 %v180_v4, %v178_v2  ;;  %v179_v10 = vld [vmem:[#allocation2 + $0x60] sm:$0xff]  ;;  %v45_v11 = vld [vmem:[#allocation2 + $0x28] sm:$0xff]  ;;  %s1670_s7 = scalar_lea.vmem %s1121_s6, 2048  ;;  %p1675_p3 = scmp.lt.s32.totalorder %s1121_s6, %s1121_s6 }
  0x29   :  { %v1143_v8 = vpack.c.bf16 %v42_v6, %v40_v5  ;;  %v177_v9 = vld [vmem:[#allocation2 + $0x50] sm:$0xff]  ;;  %1142 = vmatprep.subr.bf16.mxu0 %v1141_v3  ;;  %v47_v13 = vld [vmem:[#allocation2 + $0x38] sm:$0xff]  ;;  %v184_v15 = vld [vmem:[#allocation2 + $0x88] sm:$0xff]  ;;  %p1671_p2 = scmp.ne.s32.totalorder %s1121_s6, %s1670_s7  ;;  %p1676_p4 = scmp.lt.s32.totalorder %s1670_s7, %s1670_s7 }
  0x2a   :  { %v1203_v12 = vpack.c.bf16 %v179_v10, %v177_v9  ;;  %v182_v14 = vld [vmem:[#allocation2 + $0x78] sm:$0xff]  ;;  %1202 = vmatprep.subr.bf16.mxu1 %v1201_v7  ;;  %v1145_v16 = vpack.c.bf16 %v47_v13, %v45_v11  ;;  %v44_v18 = vld [vmem:[#allocation2 + $0x20] sm:$0xff]  ;;  %v46_v19 = vld [vmem:[#allocation2 + $0x30] sm:$0xff] }
  0x2b   :  { %1144 = vmatpush1.bf16.msra.mxu0 %v1143_v8  ;;  %v1205_v17 = vpack.c.bf16 %v184_v15, %v182_v14  ;;  %v181_v20 = vld [vmem:[#allocation2 + $0x70] sm:$0xff]  ;;  %v1147_v21 = vpack.c.bf16 %v46_v19, %v44_v18  ;;  %v183_v22 = vld [vmem:[#allocation2 + $0x80] sm:$0xff]  ;;  %v49_v23 = vld [vmem:[#allocation2 + $0x48] sm:$0xff]  ;;  %v1153_v36 = vpack.c.bf16 %v182_v14, %v180_v4  ;;  %p1677_p5 = por %p1676_p4, %p1675_p3 }
  0x2c   :  { %1204 = vmatpush1.bf16.msra.mxu1 %v1203_v12  ;;  %v186_v24 = vld [vmem:[#allocation2 + $0x98] sm:$0xff]  ;;  %1146 = vmatprep.subr.bf16.mxu0 %v1145_v16  ;;  %v1207_v25 = vpack.c.bf16 %v183_v22, %v181_v20  ;;  %v1149_v26 = vpack.c.bf16 %v178_v2, %v49_v23  ;;  %v188_v27 = vld [vmem:[#allocation2 + $0xa8] sm:$0xff]  ;;  %v48_v28 = vld [vmem:[#allocation2 + $0x40] sm:$0xff]  ;;  %v1155_v42 = vpack.c.bf16 %v181_v20, %v179_v10 }
  0x2d   :  { %1206 = vmatprep.subr.bf16.mxu1 %v1205_v17  ;;  %v185_v29 = vld [vmem:[#allocation2 + $0x90] sm:$0xff]  ;;  %v1209_v30 = vpack.c.bf16 %v188_v27, %v186_v24  ;;  %v187_v31 = vld [vmem:[#allocation2 + $0xa0] sm:$0xff]  ;;  %v190_v32 = vld [vmem:[#allocation2 + $0xb8] sm:$0xff]  ;;  %v1151_v34 = vpack.c.bf16 %v177_v9, %v48_v28  ;;  %v1157_v44 = vpack.c.bf16 %v186_v24, %v184_v15  ;;  %p1678_p6 = pnand %p1677_p5, %p1671_p2 }
  0x2e   :  { %v192_v33 = vld [vmem:[#allocation2 + $0xc8] sm:$0xff]  ;;  %v1211_v35 = vpack.c.bf16 %v187_v31, %v185_v29  ;;  %v189_v38 = vld [vmem:[#allocation2 + $0xb0] sm:$0xff]  ;;  %v191_v39 = vld [vmem:[#allocation2 + $0xc0] sm:$0xff]  ;;  %v1159_v50 = vpack.c.bf16 %v185_v29, %v183_v22  ;;  %v1745_v52 = vpack.c.bf16 %v190_v32, %v188_v27 }
  0x2f   :  { %1148 = vmatpush1.bf16.msra.mxu0 %v1147_v21  ;;  %v1213_v37 = vpack.c.bf16 %v192_v33, %v190_v32  ;;  %v194_v40 = vld [vmem:[#allocation2 + $0xd8] sm:$0xff]  ;;  %v196_v41 = vld [vmem:[#allocation2 + $0xe8] sm:$0xff]  ;;  %v1215_v43 = vpack.c.bf16 %v191_v39, %v189_v38  ;;  %v193_v46 = vld [vmem:[#allocation2 + $0xd0] sm:$0xff]  ;;  %v1749_v58 = vpack.c.bf16 %v189_v38, %v187_v31 }
  0x30   :  { %1208 = vmatpush1.bf16.msra.mxu1 %v1207_v25  ;;  %1150 = vmatprep.subr.bf16.mxu0 %v1149_v26  ;;  %v1217_v45 = vpack.c.bf16 %v196_v41, %v194_v40  ;;  %v195_v47 = vld [vmem:[#allocation2 + $0xe0] sm:$0xff]  ;;  %v198_v48 = vld [vmem:[#allocation2 + $0xf8] sm:$0xff]  ;;  %v200_v49 = vld [vmem:[#allocation2 + $0x108] sm:$0xff]  ;;  %v1754_v60 = vpack.c.bf16 %v194_v40, %v192_v33  ;;  %v1762_v3 = vpack.c.bf16 %v193_v46, %v191_v39 }
  0x31   :  { %1210 = vmatprep.subr.bf16.mxu1 %v1209_v30  ;;  %v1219_v51 = vpack.c.bf16 %v195_v47, %v193_v46  ;;  %v1747_v53 = vpack.c.bf16 %v200_v49, %v198_v48  ;;  %v197_v54 = vld [vmem:[#allocation2 + $0xf0] sm:$0xff]  ;;  %v199_v55 = vld [vmem:[#allocation2 + $0x100] sm:$0xff]  ;;  %v202_v56 = vld [vmem:[#allocation2 + $0x118] sm:$0xff]  ;;  %v1770_v5 = vpack.c.bf16 %v198_v48, %v196_v41 }
  0x32   :  { %v204_v57 = vld [vmem:[#allocation2 + $0x128] sm:$0xff]  ;;  %v1752_v59 = vpack.c.bf16 %v199_v55, %v197_v54  ;;  %v201_v62 = vld [vmem:[#allocation2 + $0x110] sm:$0xff]  ;;  %v203_v63 = vld [vmem:[#allocation2 + $0x120] sm:$0xff]  ;;  %v1778_v11 = vpack.c.bf16 %v197_v54, %v195_v47  ;;  %v1784_v13 = vpack.c.bf16 %v202_v56, %v200_v49 }
  0x33   :  { %1152 = vmatpush1.bf16.msra.mxu0 %v1151_v34  ;;  %v1757_v61 = vpack.c.bf16 %v204_v57, %v202_v56  ;;  %v206_v0 = vld [vmem:[#allocation2 + $0x138] sm:$0xff]  ;;  %v208_v1 = vld [vmem:[#allocation2 + $0x148] sm:$0xff]  ;;  %v1768_v4 = vpack.c.bf16 %v203_v63, %v201_v62  ;;  %v205_v7 = vld [vmem:[#allocation2 + $0x130] sm:$0xff]  ;;  %v1790_v19 = vpack.c.bf16 %v201_v62, %v199_v55 }
  0x34   :  { %1212 = vmatpush1.bf16.msra.mxu1 %v1211_v35  ;;  %1154 = vmatprep.subr.bf16.mxu0 %v1153_v36  ;;  %v1759_v2 = vld [vmem:[#allocation5 + $0x8] sm:$0xff]  ;;  %v1773_v6 = vpack.c.bf16 %v208_v1, %v206_v0  ;;  %v207_v8 = vld [vmem:[#allocation2 + $0x140] sm:$0xff]  ;;  %v212_v10 = vld [vmem:[#allocation2 + $0x168] sm:$0xff]  ;;  %v1796_v21 = vpack.c.bf16 %v206_v0, %v204_v57  ;;  %v1802_v27 = vpack.c.bf16 %v205_v7, %v203_v63 }
  0x35   :  { %1214 = vmatprep.subr.bf16.mxu1 %v1213_v37  ;;  %1133 = vmatprep.mubr.msk.f32.mxu0 %vm100_vm0, %v1759_v2  ;;  %v210_v9 = vld [vmem:[#allocation2 + $0x158] sm:$0xff]  ;;  %v1782_v12 = vpack.c.bf16 %v207_v8, %v205_v7  ;;  %v209_v15 = vld [vmem:[#allocation2 + $0x150] sm:$0xff]  ;;  %v211_v16 = vld [vmem:[#allocation2 + $0x160] sm:$0xff] }
  0x36   :  { %1134 = vmatprep.mubr.msk.f32.mxu1 %vm100_vm0, %v1759_v2  ;;  %v1787_v14 = vpack.c.bf16 %v212_v10, %v210_v9  ;;  %v214_v17 = vld [vmem:[#allocation2 + $0x178] sm:$0xff]  ;;  %v216_v18 = vld [vmem:[#allocation2 + $0x188] sm:$0xff]  ;;  %v1794_v20 = vpack.c.bf16 %v211_v16, %v209_v15  ;;  %v213_v23 = vld [vmem:[#allocation2 + $0x170] sm:$0xff]  ;;  %v1808_v29 = vpack.c.bf16 %v210_v9, %v208_v1  ;;  %v1814_v35 = vpack.c.bf16 %v209_v15, %v207_v8 }
  0x37   :  { %1156 = vmatpush1.bf16.msra.mxu0 %v1155_v42  ;;  %v1799_v22 = vpack.c.bf16 %v216_v18, %v214_v17  ;;  %v215_v24 = vld [vmem:[#allocation2 + $0x180] sm:$0xff]  ;;  %v218_v25 = vld [vmem:[#allocation2 + $0x198] sm:$0xff]  ;;  %v220_v26 = vld [vmem:[#allocation2 + $0x1a8] sm:$0xff]  ;;  %v1820_v37 = vpack.c.bf16 %v214_v17, %v212_v10 }
  0x38   :  { %1216 = vmatpush1.bf16.msra.mxu1 %v1215_v43  ;;  %1158 = vmatprep.subr.bf16.mxu0 %v1157_v44  ;;  %v1806_v28 = vpack.c.bf16 %v215_v24, %v213_v23  ;;  %v1811_v30 = vpack.c.bf16 %v220_v26, %v218_v25  ;;  %v217_v31 = vld [vmem:[#allocation2 + $0x190] sm:$0xff]  ;;  %v219_v32 = vld [vmem:[#allocation2 + $0x1a0] sm:$0xff]  ;;  %v222_v33 = vld [vmem:[#allocation2 + $0x1b8] sm:$0xff]  ;;  %v1828_v43 = vpack.c.bf16 %v213_v23, %v211_v16 }
  0x39   :  { %1218 = vmatprep.subr.bf16.mxu1 %v1217_v45  ;;  %v224_v34 = vld [vmem:[#allocation2 + $0x1c8] sm:$0xff]  ;;  %v1818_v36 = vpack.c.bf16 %v219_v32, %v217_v31  ;;  %v221_v39 = vld [vmem:[#allocation2 + $0x1b0] sm:$0xff]  ;;  %v223_v40 = vld [vmem:[#allocation2 + $0x1c0] sm:$0xff]  ;;  %v1834_v45 = vpack.c.bf16 %v218_v25, %v216_v18  ;;  %v1854_v55 = vpack.c.bf16 %v222_v33, %v220_v26 }
  0x3a   :  { %v1823_v38 = vpack.c.bf16 %v224_v34, %v222_v33  ;;  %v226_v41 = vld [vmem:[#allocation2 + $0x1d8] sm:$0xff]  ;;  %v1825_v42 = vld [vmem:[#allocation2 + $0x1e8] sm:$0xff]  ;;  %v1832_v44 = vpack.c.bf16 %v223_v40, %v221_v39  ;;  %v225_v47 = vld [vmem:[#allocation2 + $0x1d0] sm:$0xff]  ;;  %v1870_v1 = vpack.c.bf16 %v221_v39, %v219_v32 }
  0x3b   :  { %1160 = vmatpush1.bf16.msra.mxu0 %v1159_v50  ;;  %v1838_v46 = vpack.c.bf16 %v1825_v42, %v226_v41  ;;  %v1840_v48 = vld [vmem:[#allocation2 + $0x1e0] sm:$0xff]  ;;  %v1842_v49 = vld [vmem:[#allocation2 + $0x1f8] sm:$0xff]  ;;  %v1844_v50 = vld [vmem:[#allocation2 + $0x208] sm:$0xff]  ;;  %v1878_v8 = vpack.c.bf16 %v226_v41, %v224_v34  ;;  %v1890_v16 = vpack.c.bf16 %v225_v47, %v223_v40 }
  0x3c   :  { %1220 = vmatpush1.bf16.msra.mxu1 %v1219_v51  ;;  %1162 = vmatprep.subr.bf16.mxu0 %v1745_v52  ;;  %v1847_v51 = vpack.c.bf16 %v217_v31, %v215_v24  ;;  %v1852_v54 = vpack.c.bf16 %v1840_v48, %v225_v47  ;;  %v1859_v56 = vpack.c.bf16 %v1844_v50, %v1842_v49  ;;  %v1861_v57 = vld [vmem:[#allocation2 + $0x1f0] sm:$0xff]  ;;  %v1863_v62 = vld [vmem:[#allocation2 + $0x200] sm:$0xff]  ;;  %v1865_v63 = vld [vmem:[#allocation2 + $0x218] sm:$0xff] }
  0x3d   :  { %1222 = vmatprep.subr.bf16.mxu1 %v1747_v53  ;;  %v1867_v0 = vld [vmem:[#allocation2 + $0x228] sm:$0xff]  ;;  %v1876_v7 = vpack.c.bf16 %v1863_v62, %v1861_v57  ;;  %v1885_v10 = vld [vmem:[#allocation2 + $0x210] sm:$0xff]  ;;  %v1887_v15 = vld [vmem:[#allocation2 + $0x220] sm:$0xff] }
  0x3e   :  { %v1883_v9 = vpack.c.bf16 %v1867_v0, %v1865_v63  ;;  %v1896_v17 = vpack.c.bf16 %v1887_v15, %v1885_v10  ;;  %v1900_v18 = vld [vmem:[#allocation5] sm:$0xff]  ;;  %v1994_v26 = vld [vmem:[#allocation2 + $0x280] sm:$0xff]  ;;  %v2019_v41 = vld [vmem:[#allocation2 + $0x2b8] sm:$0xff] }
  0x3f   :  { %1164 = vmatpush1.bf16.msra.mxu0 %v1749_v58  ;;  %v493_v25 = vld [vmem:[#allocation2 + $0x270] sm:$0xff]  ;;  %v2017_v40 = vld [vmem:[#allocation2 + $0x2a0] sm:$0xff] }
  0x40   :  { %1224 = vmatpush1.bf16.msra.mxu1 %v1752_v59  ;;  %1166 = vmatprep.subr.bf16.mxu0 %v1754_v60  ;;  %v2006_v32 = vpack.c.bf16 %v1994_v26, %v493_v25  ;;  %v2015_v39 = vld [vmem:[#allocation2 + $0x290] sm:$0xff] }
  0x41   :  { %1226 = vmatprep.subr.bf16.mxu1 %v1757_v61 }
  0x43   :  { %1168 = vmatpush1.bf16.msra.mxu0 %v1762_v3 }
  0x44   :  { %1228 = vmatpush1.bf16.msra.mxu1 %v1768_v4  ;;  %1170 = vmatprep.subr.bf16.mxu0 %v1770_v5 }
  0x45   :  { %1230 = vmatprep.subr.bf16.mxu1 %v1773_v6 }
  0x47   :  { %1172 = vmatpush1.bf16.msra.mxu0 %v1778_v11 }
  0x48   :  { %1232 = vmatpush1.bf16.msra.mxu1 %v1782_v12  ;;  %1174 = vmatprep.subr.bf16.mxu0 %v1784_v13 }
  0x49   :  { %1234 = vmatprep.subr.bf16.mxu1 %v1787_v14 }
  0x4b   :  { %1176 = vmatpush1.bf16.msra.mxu0 %v1790_v19 }
  0x4c   :  { %1236 = vmatpush1.bf16.msra.mxu1 %v1794_v20  ;;  %1178 = vmatprep.subr.bf16.mxu0 %v1796_v21 }
  0x4d   :  { %1238 = vmatprep.subr.bf16.mxu1 %v1799_v22 }
  0x4f   :  { %1180 = vmatpush1.bf16.msra.mxu0 %v1802_v27 }
  0x50   :  { %1240 = vmatpush1.bf16.msra.mxu1 %v1806_v28  ;;  %1182 = vmatprep.subr.bf16.mxu0 %v1808_v29 }
  0x51   :  { %1242 = vmatprep.subr.bf16.mxu1 %v1811_v30 }
  0x53   :  { %1184 = vmatpush1.bf16.msra.mxu0 %v1814_v35 }
  0x54   :  { %1244 = vmatpush1.bf16.msra.mxu1 %v1818_v36  ;;  %1186 = vmatprep.subr.bf16.mxu0 %v1820_v37 }
  0x55   :  { %1246 = vmatprep.subr.bf16.mxu1 %v1823_v38 }
  0x57   :  { %1188 = vmatpush1.bf16.msra.mxu0 %v1828_v43 }
  0x58   :  { %1248 = vmatpush1.bf16.msra.mxu1 %v1832_v44  ;;  %1190 = vmatprep.subr.bf16.mxu0 %v1834_v45 }
  0x59   :  { %1250 = vmatprep.subr.bf16.mxu1 %v1838_v46 }
  0x5b   :  { %1192 = vmatpush1.bf16.msra.mxu0 %v1847_v51 }
  0x5c   :  { %1252 = vmatpush1.bf16.msra.mxu1 %v1852_v54  ;;  %1194 = vmatprep.subr.bf16.mxu0 %v1854_v55 }
  0x5d   :  { %1254 = vmatprep.subr.bf16.mxu1 %v1859_v56 }
  0x5f   :  { %1196 = vmatpush1.bf16.msra.mxu0 %v1870_v1 }
  0x60   :  { %1256 = vmatpush1.bf16.msra.mxu1 %v1876_v7  ;;  %1198 = vmatprep.subr.bf16.mxu0 %v1878_v8 }
  0x61   :  { %1258 = vmatprep.subr.bf16.mxu1 %v1883_v9 }
  0x63   :  { %1200 = vmatpush1.bf16.msra.mxu0 %v1890_v16 }
  0x64   :  { %1260 = vmatpush1.bf16.msra.mxu1 %v1896_v17  ;;  %1262 = vmatprep.subr.bf16.mxu0 %v1745_v52  ;;  %v1943_v52 = vld [vmem:[#allocation2 + $0x238] sm:$0xff] }
  0x65   :  { %1322 = vmatprep.subr.bf16.mxu1 %v1747_v53  ;;  %v488_v53 = vld [vmem:[#allocation2 + $0x248] sm:$0xff]  ;;  %v1988_v23 = vpack.c.bf16 %v1943_v52, %v1867_v0 }
  0x66   :  { %169 = vmatmul.mubr.f32.vlgmr.msra.gmra.mrb[0].mxu0 %v1900_v18 }
  0x67   :  { %302 = vmatmul.mubr.f32.vlgmr.msra.gmra.mrb[0].mxu1 %v1900_v18  ;;  %1264 = vmatpush1.bf16.msra.mxu0 %v1749_v58  ;;  %v1950_v58 = vpack.c.bf16 %v1842_v49, %v1825_v42  ;;  %v2021_v42 = vld [vmem:[#allocation2 + $0x2c8] sm:$0xff] }
  0x68   :  { %1324 = vmatpush1.bf16.msra.mxu1 %v1752_v59  ;;  %1266 = vmatprep.subr.bf16.mxu0 %v1754_v60  ;;  %v1954_v59 = vpack.c.bf16 %v488_v53, %v1943_v52  ;;  %v1956_v60 = vld [vmem:[#allocation2 + $0x230] sm:$0xff] }
  0x69   :  { %1326 = vmatprep.subr.bf16.mxu1 %v1757_v61  ;;  %1135 = vmatprep.mubr.msk.f32.mxu0 %vm100_vm0, %v1759_v2  ;;  %v487_v61 = vld [vmem:[#allocation2 + $0x240] sm:$0xff]  ;;  %v1311_v31 = vpack.c.bf16 %v1956_v60, %v1887_v15 }
  0x6a   :  { %1136 = vmatprep.mubr.msk.f32.mxu1 %vm100_vm0, %v1759_v2 }
  0x6b   :  { %1268 = vmatpush1.bf16.msra.mxu0 %v1762_v3  ;;  %v490_v3 = vld [vmem:[#allocation2 + $0x258] sm:$0xff] }
  0x6c   :  { %1328 = vmatpush1.bf16.msra.mxu1 %v1768_v4  ;;  %1270 = vmatprep.subr.bf16.mxu0 %v1770_v5  ;;  %v492_v4 = vld [vmem:[#allocation2 + $0x268] sm:$0xff]  ;;  %v1961_v5 = vpack.c.bf16 %v1861_v57, %v1840_v48  ;;  %v2008_v33 = vpack.c.bf16 %v490_v3, %v488_v53  ;;  %v2029_v48 = vpack.c.bf16 %v2017_v40, %v2015_v39  ;;  %v2038_v57 = vld [vmem:[#allocation2 + $0x2b0] sm:$0xff]  ;;  %v2139_v53 = vld [vmem:[#allocation2 + $0x338] sm:$0xff] }
  0x6d   :  { %1330 = vmatprep.subr.bf16.mxu1 %v1773_v6  ;;  %v1966_v6 = vpack.c.bf16 %v487_v61, %v1956_v60 }
  0x6f   :  { %1272 = vmatpush1.bf16.msra.mxu0 %v1778_v11  ;;  %v1970_v11 = vpack.c.bf16 %v1865_v63, %v1844_v50  ;;  %v2036_v50 = vpack.c.bf16 %v2021_v42, %v2019_v41 }
  0x70   :  { %1332 = vmatpush1.bf16.msra.mxu1 %v1782_v12  ;;  %1274 = vmatprep.subr.bf16.mxu0 %v1784_v13  ;;  %v1973_v12 = vpack.c.bf16 %v492_v4, %v490_v3  ;;  %v489_v13 = vld [vmem:[#allocation2 + $0x250] sm:$0xff] }
  0x71   :  { %1334 = vmatprep.subr.bf16.mxu1 %v1787_v14  ;;  %v491_v14 = vld [vmem:[#allocation2 + $0x260] sm:$0xff]  ;;  %v2023_v47 = vpack.c.bf16 %v489_v13, %v487_v61 }
  0x72   :  { %v2043_v63 = vpack.c.bf16 %v493_v25, %v491_v14  ;;  %v2178_v25 = vld [vmem:[#allocation2 + $0x350] sm:$0xff] }
  0x73   :  { %1276 = vmatpush1.bf16.msra.mxu0 %v1790_v19  ;;  %v494_v19 = vld [vmem:[#allocation2 + $0x278] sm:$0xff] }
  0x74   :  { %1336 = vmatpush1.bf16.msra.mxu1 %v1794_v20  ;;  %1278 = vmatprep.subr.bf16.mxu0 %v1796_v21  ;;  %v1975_v20 = vld [vmem:[#allocation2 + $0x288] sm:$0xff]  ;;  %v1980_v21 = vpack.c.bf16 %v1885_v10, %v1863_v62  ;;  %v2031_v49 = vpack.c.bf16 %v494_v19, %v492_v4  ;;  %v2040_v62 = vld [vmem:[#allocation2 + $0x2c0] sm:$0xff] }
  0x75   :  { %1338 = vmatprep.subr.bf16.mxu1 %v1799_v22  ;;  %v1984_v22 = vpack.c.bf16 %v491_v14, %v489_v13  ;;  %v1992_v24 = vpack.c.bf16 %v1975_v20, %v494_v19  ;;  %v2049_v0 = vpack.c.bf16 %v2040_v62, %v2038_v57  ;;  %v2161_v13 = vld [vmem:[#allocation2 + $0x340] sm:$0xff]  ;;  %v2163_v14 = vld [vmem:[#allocation2 + $0x358] sm:$0xff]  ;;  %v2165_v19 = vld [vmem:[#allocation2 + $0x368] sm:$0xff] }
  0x77   :  { %1280 = vmatpush1.bf16.msra.mxu0 %v1802_v27  ;;  %v1996_v27 = vld [vmem:[#allocation2 + $0x298] sm:$0xff] }
  0x78   :  { %1340 = vmatpush1.bf16.msra.mxu1 %v1806_v28  ;;  %1282 = vmatprep.subr.bf16.mxu0 %v1808_v29  ;;  %v1998_v28 = vld [vmem:[#allocation2 + $0x2a8] sm:$0xff] }
  0x79   :  { %1342 = vmatprep.subr.bf16.mxu1 %v1811_v30  ;;  %v2013_v34 = vpack.c.bf16 %v1998_v28, %v1996_v27 }
  0x7b   :  { %1284 = vmatpush1.bf16.msra.mxu0 %v1814_v35 }
  0x7c   :  { %1344 = vmatpush1.bf16.msra.mxu1 %v1818_v36  ;;  %1286 = vmatprep.subr.bf16.mxu0 %v1820_v37 }
  0x7d   :  { %1346 = vmatprep.subr.bf16.mxu1 %v1823_v38 }
  0x7f   :  { %1288 = vmatpush1.bf16.msra.mxu0 %v1828_v43 }
  0x80   :  { %1348 = vmatpush1.bf16.msra.mxu1 %v1832_v44  ;;  %1290 = vmatprep.subr.bf16.mxu0 %v1834_v45 }
  0x81   :  { %1350 = vmatprep.subr.bf16.mxu1 %v1838_v46 }
  0x83   :  { %1292 = vmatpush1.bf16.msra.mxu0 %v1847_v51 }
  0x84   :  { %1352 = vmatpush1.bf16.msra.mxu1 %v1852_v54  ;;  %1294 = vmatprep.subr.bf16.mxu0 %v1854_v55 }
  0x85   :  { %1354 = vmatprep.subr.bf16.mxu1 %v1859_v56 }
  0x87   :  { %1296 = vmatpush1.bf16.msra.mxu0 %v1870_v1 }
  0x88   :  { %1356 = vmatpush1.bf16.msra.mxu1 %v1876_v7  ;;  %1298 = vmatprep.subr.bf16.mxu0 %v1878_v8 }
  0x89   :  { %1358 = vmatprep.subr.bf16.mxu1 %v1883_v9 }
  0x8b   :  { %1300 = vmatpush1.bf16.msra.mxu0 %v1890_v16 }
  0x8c   :  { %1360 = vmatpush1.bf16.msra.mxu1 %v1896_v17  ;;  %1302 = vmatprep.subr.bf16.mxu0 %v1950_v58 }
  0x8d   :  { %1362 = vmatprep.subr.bf16.mxu1 %v1954_v59 }
  0x8f   :  { %1304 = vmatpush1.bf16.msra.mxu0 %v1961_v5 }
  0x90   :  { %1364 = vmatpush1.bf16.msra.mxu1 %v1966_v6  ;;  %1306 = vmatprep.subr.bf16.mxu0 %v1970_v11 }
  0x91   :  { %1366 = vmatprep.subr.bf16.mxu1 %v1973_v12 }
  0x93   :  { %1308 = vmatpush1.bf16.msra.mxu0 %v1980_v21 }
  0x94   :  { %1368 = vmatpush1.bf16.msra.mxu1 %v1984_v22  ;;  %1310 = vmatprep.subr.bf16.mxu0 %v1988_v23 }
  0x95   :  { %1370 = vmatprep.subr.bf16.mxu1 %v1992_v24 }
  0x97   :  { %1312 = vmatpush1.bf16.msra.mxu0 %v1311_v31 }
  0x98   :  { %1372 = vmatpush1.bf16.msra.mxu1 %v2006_v32  ;;  %1314 = vmatprep.subr.bf16.mxu0 %v2008_v33 }
  0x99   :  { %1374 = vmatprep.subr.bf16.mxu1 %v2013_v34 }
  0x9b   :  { %1316 = vmatpush1.bf16.msra.mxu0 %v2023_v47 }
  0x9c   :  { %1376 = vmatpush1.bf16.msra.mxu1 %v2029_v48  ;;  %1318 = vmatprep.subr.bf16.mxu0 %v2031_v49 }
  0x9d   :  { %1378 = vmatprep.subr.bf16.mxu1 %v2036_v50 }
  0x9f   :  { %1320 = vmatpush1.bf16.msra.mxu0 %v2043_v63 }
  0xa0   :  { %1380 = vmatpush1.bf16.msra.mxu1 %v2049_v0  ;;  %1382 = vmatprep.subr.bf16.mxu0 %v1808_v29  ;;  %v754_v29 = vld [vmem:[#allocation2 + $0x2d8] sm:$0xff] }
  0xa1   :  { %1442 = vmatprep.subr.bf16.mxu1 %v1811_v30  ;;  %v756_v30 = vld [vmem:[#allocation2 + $0x2e8] sm:$0xff]  ;;  %v2131_v10 = vpack.c.bf16 %v754_v29, %v2021_v42  ;;  %v847_v42 = vld [vmem:[#allocation2 + $0x1e0] sm:$0xff] }
  0xa2   :  { %436 = vmatmul.mubr.f32.vlgmr.msra.gmra.mrb[2].mxu0 %v1900_v18 }
  0xa3   :  { %570 = vmatmul.mubr.f32.vlgmr.msra.gmra.mrb[2].mxu1 %v1900_v18  ;;  %1384 = vmatpush1.bf16.msra.mxu0 %v1814_v35  ;;  %v2098_v35 = vpack.c.bf16 %v1996_v27, %v1975_v20  ;;  %v2185_v27 = vld [vmem:[#allocation2 + $0x360] sm:$0xff] }
  0xa4   :  { %1444 = vmatpush1.bf16.msra.mxu1 %v1818_v36  ;;  %1386 = vmatprep.subr.bf16.mxu0 %v1820_v37  ;;  %v2101_v36 = vpack.c.bf16 %v756_v30, %v754_v29  ;;  %v753_v37 = vld [vmem:[#allocation2 + $0x2d0] sm:$0xff]  ;;  %v854_v29 = vld [vmem:[#allocation2 + $0x218] sm:$0xff] }
  0xa5   :  { %1446 = vmatprep.subr.bf16.mxu1 %v1823_v38  ;;  %1137 = vmatprep.mubr.msk.f32.mxu0 %vm100_vm0, %v1759_v2  ;;  %v755_v38 = vld [vmem:[#allocation2 + $0x2e0] sm:$0xff]  ;;  %v2145_v61 = vpack.c.bf16 %v753_v37, %v2040_v62  ;;  %v852_v62 = vld [vmem:[#allocation2 + $0x208] sm:$0xff] }
  0xa6   :  { %1138 = vmatprep.mubr.msk.f32.mxu1 %vm100_vm0, %v1759_v2 }
  0xa7   :  { %1388 = vmatpush1.bf16.msra.mxu0 %v1828_v43  ;;  %v758_v43 = vld [vmem:[#allocation2 + $0x2f8] sm:$0xff] }
  0xa8   :  { %1448 = vmatpush1.bf16.msra.mxu1 %v1832_v44  ;;  %1390 = vmatprep.subr.bf16.mxu0 %v1834_v45  ;;  %v760_v44 = vld [vmem:[#allocation2 + $0x308] sm:$0xff]  ;;  %v2106_v45 = vpack.c.bf16 %v2015_v39, %v1994_v26  ;;  %v2152_v4 = vpack.c.bf16 %v758_v43, %v756_v30  ;;  %v2183_v26 = vpack.c.bf16 %v2165_v19, %v2163_v14 }
  0xa9   :  { %1450 = vmatprep.subr.bf16.mxu1 %v1838_v46  ;;  %v2110_v46 = vpack.c.bf16 %v755_v38, %v753_v37  ;;  %v1505_v37 = vpack.c.bf16 %v854_v29, %v852_v62 }
  0xab   :  { %1392 = vmatpush1.bf16.msra.mxu0 %v1847_v51  ;;  %v2114_v51 = vpack.c.bf16 %v2019_v41, %v1998_v28  ;;  %v848_v28 = vld [vmem:[#allocation2 + $0x1e8] sm:$0xff] }
  0xac   :  { %1452 = vmatpush1.bf16.msra.mxu1 %v1852_v54  ;;  %1394 = vmatprep.subr.bf16.mxu0 %v1854_v55  ;;  %v2117_v54 = vpack.c.bf16 %v760_v44, %v758_v43  ;;  %v757_v55 = vld [vmem:[#allocation2 + $0x2f0] sm:$0xff] }
  0xad   :  { %1454 = vmatprep.subr.bf16.mxu1 %v1859_v56  ;;  %v759_v56 = vld [vmem:[#allocation2 + $0x300] sm:$0xff]  ;;  %v2168_v20 = vpack.c.bf16 %v757_v55, %v755_v38  ;;  %v853_v43 = vld [vmem:[#allocation2 + $0x210] sm:$0xff] }
  0xae   :  { %v851_v38 = vld [vmem:[#allocation2 + $0x200] sm:$0xff] }
  0xaf   :  { %1396 = vmatpush1.bf16.msra.mxu0 %v1870_v1  ;;  %v762_v1 = vld [vmem:[#allocation2 + $0x318] sm:$0xff] }
  0xb0   :  { %1456 = vmatpush1.bf16.msra.mxu1 %v1876_v7  ;;  %1398 = vmatprep.subr.bf16.mxu0 %v1878_v8  ;;  %v2119_v7 = vld [vmem:[#allocation2 + $0x328] sm:$0xff]  ;;  %v2124_v8 = vpack.c.bf16 %v2038_v57, %v2017_v40  ;;  %v2194_v40 = vpack.c.bf16 %v2185_v27, %v2178_v25  ;;  %v849_v57 = vld [vmem:[#allocation2 + $0x1f0] sm:$0xff] }
  0xb1   :  { %1458 = vmatprep.subr.bf16.mxu1 %v1883_v9  ;;  %v2128_v9 = vpack.c.bf16 %v759_v56, %v757_v55  ;;  %v2135_v15 = vpack.c.bf16 %v2119_v7, %v762_v1  ;;  %v1503_v30 = vpack.c.bf16 %v849_v57, %v847_v42  ;;  %v1507_v55 = vpack.c.bf16 %v853_v43, %v851_v38 }
  0xb3   :  { %1400 = vmatpush1.bf16.msra.mxu0 %v1890_v16  ;;  %v761_v16 = vld [vmem:[#allocation2 + $0x310] sm:$0xff] }
  0xb4   :  { %1460 = vmatpush1.bf16.msra.mxu1 %v1896_v17  ;;  %1402 = vmatprep.subr.bf16.mxu0 %v1950_v58  ;;  %v2137_v17 = vld [vmem:[#allocation2 + $0x320] sm:$0xff]  ;;  %v2141_v58 = vld [vmem:[#allocation2 + $0x348] sm:$0xff]  ;;  %v2188_v39 = vpack.c.bf16 %v761_v16, %v759_v56 }
  0xb5   :  { %1462 = vmatprep.subr.bf16.mxu1 %v1954_v59  ;;  %v2150_v3 = vpack.c.bf16 %v2137_v17, %v761_v16 }
  0xb7   :  { %1404 = vmatpush1.bf16.msra.mxu0 %v1961_v5  ;;  %v2157_v5 = vpack.c.bf16 %v2141_v58, %v2139_v53 }
  0xb8   :  { %1464 = vmatpush1.bf16.msra.mxu1 %v1966_v6  ;;  %1406 = vmatprep.subr.bf16.mxu0 %v1970_v11  ;;  %v2159_v11 = vld [vmem:[#allocation2 + $0x330] sm:$0xff] }
  0xb9   :  { %1466 = vmatprep.subr.bf16.mxu1 %v1973_v12 }
  0xbb   :  { %1408 = vmatpush1.bf16.msra.mxu0 %v1980_v21  ;;  %v2174_v21 = vpack.c.bf16 %v2161_v13, %v2159_v11 }
  0xbc   :  { %1468 = vmatpush1.bf16.msra.mxu1 %v1984_v22  ;;  %1410 = vmatprep.subr.bf16.mxu0 %v1988_v23  ;;  %v2176_v23 = vpack.c.bf16 %v762_v1, %v760_v44  ;;  %v856_v44 = vld [vmem:[#allocation2 + $0x228] sm:$0xff]  ;;  %v855_v1 = vld [vmem:[#allocation2 + $0x220] sm:$0xff] }
  0xbd   :  { %1470 = vmatprep.subr.bf16.mxu1 %v1992_v24  ;;  %v1509_v56 = vpack.c.bf16 %v1943_v52, %v856_v44  ;;  %v1024_v52 = vld [vmem:[#allocation2 + $0x388] sm:$0xff] }
  0xbf   :  { %1412 = vmatpush1.bf16.msra.mxu0 %v1311_v31  ;;  %v850_v31 = vld [vmem:[#allocation2 + $0x1f8] sm:$0xff] }
  0xc0   :  { %1472 = vmatpush1.bf16.msra.mxu1 %v2006_v32  ;;  %1414 = vmatprep.subr.bf16.mxu0 %v2008_v33  ;;  %v1501_v41 = vpack.c.bf16 %v850_v31, %v848_v28 }
  0xc1   :  { %1474 = vmatprep.subr.bf16.mxu1 %v2013_v34 }
  0xc3   :  { %1416 = vmatpush1.bf16.msra.mxu0 %v2023_v47 }
  0xc4   :  { %1476 = vmatpush1.bf16.msra.mxu1 %v2029_v48  ;;  %1418 = vmatprep.subr.bf16.mxu0 %v2031_v49 }
  0xc5   :  { %1478 = vmatprep.subr.bf16.mxu1 %v2036_v50 }
  0xc7   :  { %1420 = vmatpush1.bf16.msra.mxu0 %v2043_v63 }
  0xc8   :  { %1480 = vmatpush1.bf16.msra.mxu1 %v2049_v0  ;;  %1422 = vmatprep.subr.bf16.mxu0 %v2098_v35 }
  0xc9   :  { %1482 = vmatprep.subr.bf16.mxu1 %v2101_v36 }
  0xcb   :  { %1424 = vmatpush1.bf16.msra.mxu0 %v2106_v45 }
  0xcc   :  { %1484 = vmatpush1.bf16.msra.mxu1 %v2110_v46  ;;  %1426 = vmatprep.subr.bf16.mxu0 %v2114_v51 }
  0xcd   :  { %1486 = vmatprep.subr.bf16.mxu1 %v2117_v54 }
  0xcf   :  { %1428 = vmatpush1.bf16.msra.mxu0 %v2124_v8 }
  0xd0   :  { %1488 = vmatpush1.bf16.msra.mxu1 %v2128_v9  ;;  %1430 = vmatprep.subr.bf16.mxu0 %v2131_v10 }
  0xd1   :  { %1490 = vmatprep.subr.bf16.mxu1 %v2135_v15 }
  0xd3   :  { %1432 = vmatpush1.bf16.msra.mxu0 %v2145_v61 }
  0xd4   :  { %1492 = vmatpush1.bf16.msra.mxu1 %v2150_v3  ;;  %1434 = vmatprep.subr.bf16.mxu0 %v2152_v4 }
  0xd5   :  { %1494 = vmatprep.subr.bf16.mxu1 %v2157_v5 }
  0xd7   :  { %1436 = vmatpush1.bf16.msra.mxu0 %v2168_v20 }
  0xd8   :  { %1496 = vmatpush1.bf16.msra.mxu1 %v2174_v21  ;;  %1438 = vmatprep.subr.bf16.mxu0 %v2176_v23 }
  0xd9   :  { %1498 = vmatprep.subr.bf16.mxu1 %v2183_v26 }
  0xdb   :  { %1440 = vmatpush1.bf16.msra.mxu0 %v2188_v39 }
  0xdc   :  { %1500 = vmatpush1.bf16.msra.mxu1 %v2194_v40  ;;  %1502 = vmatprep.subr.bf16.mxu0 %v1501_v41 }
  0xdd   :  { %1562 = vmatprep.subr.bf16.mxu1 %v1954_v59  ;;  %v1511_v59 = vpack.c.bf16 %v1956_v60, %v855_v1  ;;  %v1541_v60 = vpack.c.bf16 %v2139_v53, %v2119_v7  ;;  %v1034_v7 = vld [vmem:[#allocation2 + $0x3d8] sm:$0xff]  ;;  %v1035_v53 = vld [vmem:[#allocation2 + $0x3e0] sm:$0xff] }
  0xde   :  { %704 = vmatmul.mubr.f32.vlgmr.msra.gmra.mrb[4].mxu0 %v1900_v18 }
  0xdf   :  { %838 = vmatmul.mubr.f32.vlgmr.msra.gmra.mrb[4].mxu1 %v1900_v18  ;;  %1504 = vmatpush1.bf16.msra.mxu0 %v1503_v30 }
  0xe0   :  { %1564 = vmatpush1.bf16.msra.mxu1 %v1966_v6  ;;  %1506 = vmatprep.subr.bf16.mxu0 %v1505_v37 }
  0xe1   :  { %1566 = vmatprep.subr.bf16.mxu1 %v1973_v12  ;;  %1139 = vmatprep.mubr.msk.f32.mxu0 %vm100_vm0, %v1759_v2  ;;  %v1021_v12 = vld [vmem:[#allocation2 + $0x370] sm:$0xff] }
  0xe2   :  { %1140 = vmatprep.mubr.msk.f32.mxu1 %vm100_vm0, %v1759_v2  ;;  %v1022_v2 = vld [vmem:[#allocation2 + $0x378] sm:$0xff] }
  0xe3   :  { %1508 = vmatpush1.bf16.msra.mxu0 %v1507_v55  ;;  %v1601_v6 = vpack.c.bf16 %v1024_v52, %v1022_v2 }
  0xe4   :  { %1568 = vmatpush1.bf16.msra.mxu1 %v1984_v22  ;;  %1510 = vmatprep.subr.bf16.mxu0 %v1509_v56  ;;  %v1023_v22 = vld [vmem:[#allocation2 + $0x380] sm:$0xff] }
  0xe5   :  { %1570 = vmatprep.subr.bf16.mxu1 %v1992_v24  ;;  %v1026_v24 = vld [vmem:[#allocation2 + $0x398] sm:$0xff] }
  0xe7   :  { %1512 = vmatpush1.bf16.msra.mxu0 %v1511_v59 }
  0xe8   :  { %1572 = vmatpush1.bf16.msra.mxu1 %v2006_v32  ;;  %1514 = vmatprep.subr.bf16.mxu0 %v2008_v33  ;;  %v1028_v32 = vld [vmem:[#allocation2 + $0x3a8] sm:$0xff]  ;;  %v1543_v33 = vpack.c.bf16 %v2159_v11, %v2137_v17  ;;  %v1033_v17 = vld [vmem:[#allocation2 + $0x3d0] sm:$0xff] }
  0xe9   :  { %1574 = vmatprep.subr.bf16.mxu1 %v2013_v34  ;;  %v1603_v34 = vpack.c.bf16 %v1023_v22, %v1021_v12 }
  0xeb   :  { %1516 = vmatpush1.bf16.msra.mxu0 %v2023_v47  ;;  %v1545_v47 = vpack.c.bf16 %v2163_v14, %v2141_v58  ;;  %v1038_v58 = vld [vmem:[#allocation2 + $0x3f8] sm:$0xff]  ;;  %v1039_v14 = vld [vmem:[#allocation2 + $0x400] sm:$0xff] }
  0xec   :  { %1576 = vmatpush1.bf16.msra.mxu1 %v2029_v48  ;;  %1518 = vmatprep.subr.bf16.mxu0 %v2031_v49  ;;  %v1605_v48 = vpack.c.bf16 %v1028_v32, %v1026_v24  ;;  %v1025_v49 = vld [vmem:[#allocation2 + $0x390] sm:$0xff] }
  0xed   :  { %1578 = vmatprep.subr.bf16.mxu1 %v2036_v50  ;;  %v1027_v50 = vld [vmem:[#allocation2 + $0x3a0] sm:$0xff] }
  0xef   :  { %1520 = vmatpush1.bf16.msra.mxu0 %v2043_v63  ;;  %v1030_v63 = vld [vmem:[#allocation2 + $0x3b8] sm:$0xff] }
  0xf0   :  { %1580 = vmatpush1.bf16.msra.mxu1 %v2049_v0  ;;  %1522 = vmatprep.subr.bf16.mxu0 %v2098_v35  ;;  %v1032_v0 = vld [vmem:[#allocation2 + $0x3c8] sm:$0xff]  ;;  %v1547_v35 = vpack.c.bf16 %v2178_v25, %v2161_v13  ;;  %v1037_v13 = vld [vmem:[#allocation2 + $0x3f0] sm:$0xff] }
  0xf1   :  { %1582 = vmatprep.subr.bf16.mxu1 %v2101_v36  ;;  %v1607_v36 = vpack.c.bf16 %v1027_v50, %v1025_v49 }
  0xf3   :  { %1524 = vmatpush1.bf16.msra.mxu0 %v2106_v45  ;;  %v1549_v45 = vpack.c.bf16 %v1022_v2, %v2165_v19 }
  0xf4   :  { %1584 = vmatpush1.bf16.msra.mxu1 %v2110_v46  ;;  %1526 = vmatprep.subr.bf16.mxu0 %v2114_v51  ;;  %v1609_v46 = vpack.c.bf16 %v1032_v0, %v1030_v63  ;;  %v1029_v51 = vld [vmem:[#allocation2 + $0x3b0] sm:$0xff] }
  0xf5   :  { %1586 = vmatprep.subr.bf16.mxu1 %v2117_v54  ;;  %v1031_v54 = vld [vmem:[#allocation2 + $0x3c0] sm:$0xff]  ;;  %v1559_v19 = vpack.c.bf16 %v1029_v51, %v1027_v50 }
  0xf7   :  { %1528 = vmatpush1.bf16.msra.mxu0 %v2124_v8  ;;  %v1036_v8 = vld [vmem:[#allocation2 + $0x3e8] sm:$0xff] }
  0xf8   :  { %1588 = vmatpush1.bf16.msra.mxu1 %v2128_v9  ;;  %1530 = vmatprep.subr.bf16.mxu0 %v2131_v10  ;;  %v1551_v9 = vpack.c.bf16 %v1021_v12, %v2185_v27  ;;  %v1611_v10 = vpack.c.bf16 %v1031_v54, %v1029_v51  ;;  %v1613_v16 = vpack.c.bf16 %v1036_v8, %v1034_v7 }
  0xf9   :  { %1590 = vmatprep.subr.bf16.mxu1 %v2135_v15  ;;  %v1553_v15 = vpack.c.bf16 %v1026_v24, %v1024_v52 }
  0xfb   :  { %1532 = vmatpush1.bf16.msra.mxu0 %v2145_v61  ;;  %v1040_v61 = vld [vmem:[#allocation2 + $0x408] sm:$0xff] }
  0xfc   :  { %1592 = vmatpush1.bf16.msra.mxu1 %v2150_v3  ;;  %1534 = vmatprep.subr.bf16.mxu0 %v2152_v4  ;;  %v1555_v3 = vpack.c.bf16 %v1025_v49, %v1023_v22  ;;  %v1615_v4 = vpack.c.bf16 %v1035_v53, %v1033_v17  ;;  %v1617_v11 = vpack.c.bf16 %v1040_v61, %v1038_v58 }
  0xfd   :  { %1594 = vmatprep.subr.bf16.mxu1 %v2157_v5  ;;  %v1557_v5 = vpack.c.bf16 %v1030_v63, %v1028_v32 }
  0xff   :  { %1536 = vmatpush1.bf16.msra.mxu0 %v2168_v20  ;;  %v1619_v20 = vpack.c.bf16 %v1039_v14, %v1037_v13 }
 0x100   :  { %1596 = vmatpush1.bf16.msra.mxu1 %v2174_v21  ;;  %1538 = vmatprep.subr.bf16.mxu0 %v2176_v23 }
 0x101   :  { %1598 = vmatprep.subr.bf16.mxu1 %v2183_v26 }
 0x103   :  { %1540 = vmatpush1.bf16.msra.mxu0 %v2188_v39 }
 0x104   :  { %1600 = vmatpush1.bf16.msra.mxu1 %v2194_v40  ;;  %1542 = vmatprep.subr.bf16.mxu0 %v1541_v60 }
 0x105   :  { %1602 = vmatprep.subr.bf16.mxu1 %v1601_v6 }
 0x107   :  { %1544 = vmatpush1.bf16.msra.mxu0 %v1543_v33 }
 0x108   :  { %1604 = vmatpush1.bf16.msra.mxu1 %v1603_v34  ;;  %1546 = vmatprep.subr.bf16.mxu0 %v1545_v47 }
 0x109   :  { %1606 = vmatprep.subr.bf16.mxu1 %v1605_v48 }
 0x10b   :  { %1548 = vmatpush1.bf16.msra.mxu0 %v1547_v35 }
 0x10c   :  { %1608 = vmatpush1.bf16.msra.mxu1 %v1607_v36  ;;  %1550 = vmatprep.subr.bf16.mxu0 %v1549_v45 }
 0x10d   :  { %1610 = vmatprep.subr.bf16.mxu1 %v1609_v46 }
 0x10f   :  { %1552 = vmatpush1.bf16.msra.mxu0 %v1551_v9 }
 0x110   :  { %1612 = vmatpush1.bf16.msra.mxu1 %v1611_v10  ;;  %1554 = vmatprep.subr.bf16.mxu0 %v1553_v15 }
 0x111   :  { %1614 = vmatprep.subr.bf16.mxu1 %v1613_v16 }
 0x113   :  { %1556 = vmatpush1.bf16.msra.mxu0 %v1555_v3 }
 0x114   :  { %1616 = vmatpush1.bf16.msra.mxu1 %v1615_v4  ;;  %1558 = vmatprep.subr.bf16.mxu0 %v1557_v5 }
 0x115   :  { %1618 = vmatprep.subr.bf16.mxu1 %v1617_v11 }
 0x117   :  { %1560 = vmatpush1.bf16.msra.mxu0 %v1559_v19 }
 0x118   :  { %1620 = vmatpush1.bf16.msra.mxu1 %v1619_v20 }
 0x11a   :  { %972 = vmatmul.mubr.f32.vlgmr.msra.gmra.mrb[6].mxu0 %v1900_v18 }
 0x11b   :  { %1106 = vmatmul.mubr.f32.vlgmr.msra.gmra.mrb[6].mxu1 %v1900_v18 }
 0x139   :  { %v170_v21 = vpop.f32.mrb[0].mxu0 }
 0x13a   :  { %175 = vst [vmem:[#allocation7] sm:$0xff] %v170_v21  ;;  %v303_v23 = vpop.f32.mrb[0].mxu1  ;;  %v172_v25 = vpop.f32.mrb[1].mxu0 }
 0x13b   :  { %309 = vst [vmem:[#allocation7 + $0x10] sm:$0xff] %v303_v23  ;;  %176 = vst [vmem:[#allocation7 + $0x8] sm:$0xff] %v172_v25  ;;  %v305_v26 = vpop.f32.mrb[1].mxu1 }
 0x13c   :  { %310 = vst [vmem:[#allocation7 + $0x18] sm:$0xff] %v305_v26 }
 0x175   :  { %v437_v27 = vpop.f32.mrb[2].mxu0 }
 0x176   :  { %443 = vst [vmem:[#allocation7 + $0x20] sm:$0xff] %v437_v27  ;;  %v571_v28 = vpop.f32.mrb[2].mxu1  ;;  %v439_v31 = vpop.f32.mrb[3].mxu0 }
 0x177   :  { %577 = vst [vmem:[#allocation7 + $0x30] sm:$0xff] %v571_v28  ;;  %444 = vst [vmem:[#allocation7 + $0x28] sm:$0xff] %v439_v31  ;;  %v573_v39 = vpop.f32.mrb[3].mxu1 }
 0x178   :  { %578 = vst [vmem:[#allocation7 + $0x38] sm:$0xff] %v573_v39 }
 0x1b1   :  { %v705_v40 = vpop.f32.mrb[4].mxu0 }
 0x1b2   :  { %711 = vst [vmem:[#allocation7 + $0x40] sm:$0xff] %v705_v40  ;;  %v839_v41 = vpop.f32.mrb[4].mxu1  ;;  %v707_v18 = vpop.f32.mrb[5].mxu0 }
 0x1b3   :  { %845 = vst [vmem:[#allocation7 + $0x50] sm:$0xff] %v839_v41  ;;  %712 = vst [vmem:[#allocation7 + $0x48] sm:$0xff] %v707_v18  ;;  %v841_v42 = vpop.f32.mrb[5].mxu1 }
 0x1b4   :  { %846 = vst [vmem:[#allocation7 + $0x58] sm:$0xff] %v841_v42 }
 0x1ed   :  { %v973_v57 = vpop.f32.mrb[6].mxu0 }
 0x1ee   :  { %979 = vst [vmem:[#allocation7 + $0x60] sm:$0xff] %v973_v57  ;;  %v1107_v62 = vpop.f32.mrb[6].mxu1  ;;  %v975_v29 = vpop.f32.mrb[7].mxu0 }
 0x1ef   :  { %1113 = vst [vmem:[#allocation7 + $0x70] sm:$0xff] %v1107_v62  ;;  %980 = vst [vmem:[#allocation7 + $0x68] sm:$0xff] %v975_v29  ;;  %v1109_v30 = vpop.f32.mrb[7].mxu1 }
 0x1f0   :  { %1114 = vst [vmem:[#allocation7 + $0x78] sm:$0xff] %v1109_v30 }
 0x1f1   :  { %1681 = shalt.err (!%p1678_p6)
}
 0x1f2   :  { %s1682_s10 = scalar_lea.hbm %s2270_s2, 2048 }
 0x1f3   :  { %p1683_p7 = scmp.ne.s32.totalorder %s2270_s2, %s1682_s10  ;;  %p1686_p8 = scmp.lt.u32.totalorder %s1682_s10, %s2270_s2 }
 0x1f5   :  { %p1688_p9 = pnand %p1686_p8, %p1683_p7 }
 0x1f7   :  { %1691 = shalt.err (!%p1688_p9)
}
 0x1f8   :  { %1126 = dma.vmem_to_hbm [thread:$0]  %s1121_s6, 2048, %s2270_s2, [#allocation4], %s1699_s19, %s1699_s19, %s1700_s20  }
 0x1f9   :  { %1696 = dma.done.wait [#allocation4], 2048  }
 0x1fa   :  { %1697 = vsyncadd [#allocation4], 4294965248 }
 0x1fb   :  { %1130 = vsyncpa [#allocation3], 1 }
 0x1fc   :  { %1131 = vsyncpa [#allocation6], 1 }
 0x1fd   :  { %1132 = vsyncpa [#allocation4], 1 }

</bundles_post_ra>
